<compile_context>
chip_gen: v6e
topology: v6e:2x2x1
jax: 0.10.0
libtpu: 0.0.40
codegen_flags: <defaults>
</compile_context>

<pallas_src>
import jax
import jax.numpy as jnp
from jax import lax
from jax.experimental import pallas as pl
from jax.experimental.pallas import tpu as pltpu


def addinfo_kernel(a_ref, b1_ref, b2_ref, w_ref, bias_ref, o_ref):
    """Shared-Linear + LeakyReLU(0.2) on A,B1,B2, combined as A + (B1 - B2)."""
    w = w_ref[...]          # [2*dim, dim], resident (Buffered(1))
    bias = bias_ref[...]    # [1, 2*dim], f32

    def branch(x):
        # x @ W^T, contracting last dims of both operands (no transpose).
        y = lax.dot_general(
            x, w,
            dimension_numbers=(((1,), (1,)), ((), ())),
            preferred_element_type=jnp.float32,
        )                                   # [TN, 2*dim] f32
        y = y + bias
        return jnp.maximum(y, 0.2 * y)      # LeakyReLU(0.2), single VALU op

    acc = branch(a_ref[...])
    acc = acc + branch(b1_ref[...])
    acc = acc - branch(b2_ref[...])
    o_ref[...] = acc.astype(o_ref.dtype)


def add_info_forward(A, B1, B2, W, b, *, block_n=512):
    """A, B1, B2: [N, dim]; W: [2*dim, dim] (PyTorch layout); b: [2*dim]."""
    N, dim = A.shape
    out_dim, dim_w = W.shape
    assert dim_w == dim and out_dim == 2 * dim and b.shape == (out_dim,)
    assert dim % 128 == 0, "dim must be a multiple of 128 (pad upstream)"

    tn = min(block_n, N)
    assert N % tn == 0, "batch must divide the block size (pad upstream if not)"
    assert tn % 8 == 0, "row tile must be sublane-aligned (multiple of 8)"

    bias = b.astype(jnp.float32).reshape(1, out_dim)
    grid = (N // tn,)

    # Explicit scoped-VMEM budget: double-buffered input/output tiles,
    # single-buffered resident W/bias, plus live f32 intermediates, +25%.
    in_itm = jnp.dtype(A.dtype).itemsize
    w_itm = jnp.dtype(W.dtype).itemsize
    needed = (
        3 * 2 * tn * dim * in_itm          # A, B1, B2 tiles (double-buffered)
        + out_dim * dim * w_itm            # W, Buffered(1)
        + out_dim * 4                      # bias, f32
        + 2 * tn * out_dim * in_itm        # output tiles (double-buffered)
        + 2 * tn * out_dim * 4             # f32 acc + branch intermediate
    )
    vmem_limit = int(min(max(needed * 5 // 4, 32 << 20), 64 << 20))

    return pl.pallas_call(
        addinfo_kernel,
        out_shape=jax.ShapeDtypeStruct((N, out_dim), A.dtype),
        grid_spec=pltpu.PrefetchScalarGridSpec(
            num_scalar_prefetch=0,
            grid=grid,
            in_specs=[
                pl.BlockSpec((tn, dim), lambda i: (i, 0)),       # A tile
                pl.BlockSpec((tn, dim), lambda i: (i, 0)),       # B1 tile
                pl.BlockSpec((tn, dim), lambda i: (i, 0)),       # B2 tile
                pl.BlockSpec((out_dim, dim), lambda i: (0, 0),   # W resident
                             pipeline_mode=pl.Buffered(1)),
                pl.BlockSpec((1, out_dim), lambda i: (0, 0),     # bias resident
                             pipeline_mode=pl.Buffered(1)),
            ],
            out_specs=pl.BlockSpec((tn, out_dim), lambda i: (i, 0)),
        ),
        compiler_params=pltpu.CompilerParams(
            dimension_semantics=("parallel",),   # batch tiles are independent
            vmem_limit_bytes=vmem_limit,
        ),
    )(A, B1, B2, W, bias)


if __name__ == "__main__":
    key = jax.random.PRNGKey(0)
    N, dim = 32, 128            # small, TPU-tile-aligned test shapes
    out_dim = 2 * dim

    kA, kB1, kB2, kW, kb = jax.random.split(key, 5)
    A = jax.random.normal(kA, (N, dim), dtype=jnp.float32).astype(jnp.bfloat16)
    B1 = jax.random.normal(kB1, (N, dim), dtype=jnp.float32).astype(jnp.bfloat16)
    B2 = jax.random.normal(kB2, (N, dim), dtype=jnp.float32).astype(jnp.bfloat16)

    # nn.Linear-shaped parameters: W [2*dim, dim] (bf16), b [2*dim] (f32)
    bound = 1.0 / jnp.sqrt(dim)
    W = jax.random.uniform(kW, (out_dim, dim), minval=-bound, maxval=bound,
                           dtype=jnp.float32).astype(jnp.bfloat16)
    b = jax.random.uniform(kb, (out_dim,), minval=-bound, maxval=bound,
                           dtype=jnp.float32)

    # block_n=16 -> 2 grid steps, exercising the pipelined "parallel" batch axis.
    out = add_info_forward(A, B1, B2, W, b, block_n=16)
    out = jax.block_until_ready(out)

    # Pure-JAX reference (bf16 inputs, f32 math) -- eval-mode dropout = identity.
    A32, B132, B232 = (x.astype(jnp.float32) for x in (A, B1, B2))
    W32 = W.astype(jnp.float32)

    def ref_branch(x):
        y = x @ W32.T + b
        return jnp.maximum(y, 0.2 * y)

    ref = ref_branch(A32) + (ref_branch(B132) - ref_branch(B232))
    assert out.shape == (N, out_dim)
    # bf16 output -> loosened tolerance vs the f32 reference.
    assert jnp.allclose(out.astype(jnp.float32), ref, atol=5e-2, rtol=5e-2)

    print("KERNEL_OK")
</pallas_src>

<mosaic_0001>
module attributes {stable_mosaic.version = 11 : i64} {
  func.func @addinfo_kernel(%arg0: i32, %arg1: memref<16x128xbf16, #tpu.memory_space<vmem>>, %arg2: memref<16x128xbf16, #tpu.memory_space<vmem>>, %arg3: memref<16x128xbf16, #tpu.memory_space<vmem>>, %arg4: memref<256x128xbf16, #tpu.memory_space<vmem>>, %arg5: memref<1x256xf32, #tpu.memory_space<vmem>>, %arg6: memref<16x256xbf16, #tpu.memory_space<vmem>>) attributes {dimension_semantics = [#tpu.dimension_semantics<parallel>], iteration_bounds = array<i64: 2>, scalar_prefetch = 0 : i64, scratch_operands = 0 : i64, tpu.core_type = #tpu.core_type<tc>, window_params = [{transform_indices = @transform_0, window_bounds = array<i64: 16, 128>}, {transform_indices = @transform_1, window_bounds = array<i64: 16, 128>}, {transform_indices = @transform_2, window_bounds = array<i64: 16, 128>}, {pipeline_mode = #tpu.pipeline_mode<synchronous>, transform_indices = @transform_3, window_bounds = array<i64: 256, 128>}, {pipeline_mode = #tpu.pipeline_mode<synchronous>, transform_indices = @transform_4, window_bounds = array<i64: 1, 256>}, {transform_indices = @transform_5, window_bounds = array<i64: 16, 256>}]} {
    %c0 = arith.constant 0 : index
    %c0_0 = arith.constant 0 : index
    %0 = vector.load %arg4[%c0, %c0_0] : memref<256x128xbf16, #tpu.memory_space<vmem>>, vector<256x128xbf16>
    %c0_1 = arith.constant 0 : index
    %c0_2 = arith.constant 0 : index
    %1 = vector.load %arg5[%c0_1, %c0_2] : memref<1x256xf32, #tpu.memory_space<vmem>>, vector<1x256xf32>
    %c0_3 = arith.constant 0 : index
    %c0_4 = arith.constant 0 : index
    %2 = vector.load %arg1[%c0_3, %c0_4] : memref<16x128xbf16, #tpu.memory_space<vmem>>, vector<16x128xbf16>
    %cst = arith.constant dense<0.000000e+00> : vector<16x256xf32>
    %3 = tpu.matmul %2, %0, %cst {dimension_numbers = #tpu.dot_dimension_numbers<[1], [1], [0], [0], [0, 0, 1, 0], [], []>} : vector<16x128xbf16>, vector<256x128xbf16>, vector<16x256xf32> -> vector<16x256xf32>
    %4 = vector.broadcast %1 : vector<1x256xf32> to vector<16x256xf32>
    %5 = arith.addf %3, %4 : vector<16x256xf32>
    %cst_5 = arith.constant 2.000000e-01 : f32
    %6 = vector.broadcast %cst_5 : f32 to vector<16x256xf32>
    %7 = arith.mulf %6, %5 : vector<16x256xf32>
    %8 = arith.maximumf %5, %7 : vector<16x256xf32>
    %c0_6 = arith.constant 0 : index
    %c0_7 = arith.constant 0 : index
    %9 = vector.load %arg2[%c0_6, %c0_7] : memref<16x128xbf16, #tpu.memory_space<vmem>>, vector<16x128xbf16>
    %cst_8 = arith.constant dense<0.000000e+00> : vector<16x256xf32>
    %10 = tpu.matmul %9, %0, %cst_8 {dimension_numbers = #tpu.dot_dimension_numbers<[1], [1], [0], [0], [0, 0, 1, 0], [], []>} : vector<16x128xbf16>, vector<256x128xbf16>, vector<16x256xf32> -> vector<16x256xf32>
    %11 = vector.broadcast %1 : vector<1x256xf32> to vector<16x256xf32>
    %12 = arith.addf %10, %11 : vector<16x256xf32>
    %cst_9 = arith.constant 2.000000e-01 : f32
    %13 = vector.broadcast %cst_9 : f32 to vector<16x256xf32>
    %14 = arith.mulf %13, %12 : vector<16x256xf32>
    %15 = arith.maximumf %12, %14 : vector<16x256xf32>
    %16 = arith.addf %8, %15 : vector<16x256xf32>
    %c0_10 = arith.constant 0 : index
    %c0_11 = arith.constant 0 : index
    %17 = vector.load %arg3[%c0_10, %c0_11] : memref<16x128xbf16, #tpu.memory_space<vmem>>, vector<16x128xbf16>
    %cst_12 = arith.constant dense<0.000000e+00> : vector<16x256xf32>
    %18 = tpu.matmul %17, %0, %cst_12 {dimension_numbers = #tpu.dot_dimension_numbers<[1], [1], [0], [0], [0, 0, 1, 0], [], []>} : vector<16x128xbf16>, vector<256x128xbf16>, vector<16x256xf32> -> vector<16x256xf32>
    %19 = vector.broadcast %1 : vector<1x256xf32> to vector<16x256xf32>
    %20 = arith.addf %18, %19 : vector<16x256xf32>
    %cst_13 = arith.constant 2.000000e-01 : f32
    %21 = vector.broadcast %cst_13 : f32 to vector<16x256xf32>
    %22 = arith.mulf %21, %20 : vector<16x256xf32>
    %23 = arith.maximumf %20, %22 : vector<16x256xf32>
    %24 = arith.subf %16, %23 : vector<16x256xf32>
    %25 = arith.truncf %24 : vector<16x256xf32> to vector<16x256xbf16>
    %c0_14 = arith.constant 0 : index
    %c0_15 = arith.constant 0 : index
    %26 = vector.load %arg6[%c0_14, %c0_15] : memref<16x256xbf16, #tpu.memory_space<vmem>>, vector<16x256xbf16>
    tpu.vector_store %arg6[%c0_14, %c0_15], %25 {strides = array<i32>} : memref<16x256xbf16, #tpu.memory_space<vmem>>, vector<16x256xbf16>,
    return
  }
  func.func @transform_0(%arg0: i32) -> (i32, i32) {
    %c0_i32 = arith.constant 0 : i32
    %c0_i32_0 = arith.constant 0 : i32
    return %arg0, %c0_i32 : i32, i32
  }
  func.func @transform_1(%arg0: i32) -> (i32, i32) {
    %c0_i32 = arith.constant 0 : i32
    %c0_i32_0 = arith.constant 0 : i32
    return %arg0, %c0_i32 : i32, i32
  }
  func.func @transform_2(%arg0: i32) -> (i32, i32) {
    %c0_i32 = arith.constant 0 : i32
    %c0_i32_0 = arith.constant 0 : i32
    return %arg0, %c0_i32 : i32, i32
  }
  func.func @transform_3(%arg0: i32) -> (i32, i32) {
    %c0_i32 = arith.constant 0 : i32
    %c0_i32_0 = arith.constant 0 : i32
    %c0_i32_1 = arith.constant 0 : i32
    return %c0_i32, %c0_i32_0 : i32, i32
  }
  func.func @transform_4(%arg0: i32) -> (i32, i32) {
    %c0_i32 = arith.constant 0 : i32
    %c0_i32_0 = arith.constant 0 : i32
    %c0_i32_1 = arith.constant 0 : i32
    return %c0_i32, %c0_i32_0 : i32, i32
  }
  func.func @transform_5(%arg0: i32) -> (i32, i32) {
    %c0_i32 = arith.constant 0 : i32
    %c0_i32_0 = arith.constant 0 : i32
    return %arg0, %c0_i32 : i32, i32
  }
}

</mosaic_0001>

<bundles_post_ra>
// kernel: tpu_custom_call.1
= control target key start
LH: loop header
LB: loop body
LE: loop exit
PB: predicated region body
PF: predicated region fallthrough
CT: control target
= control target key end

     0   :  { %s1528_s0 = inlined_call_operand.hbm [shape: bf16[32,128], index: 0, kind: input, shape index: {}]   ;;  %s1529_s1 = inlined_call_operand.hbm [shape: bf16[32,128], index: 1, kind: input, shape index: {}]   ;;  %s1530_s2 = inlined_call_operand.hbm [shape: bf16[32,128], index: 2, kind: input, shape index: {}]   ;;  %s1531_s3 = inlined_call_operand.hbm [shape: bf16[256,128], index: 3, kind: input, shape index: {}]   ;;  %s1532_s4 = inlined_call_operand.vmem [shape: f32[1,256], index: 4, kind: input, shape index: {}]   ;;  %s1533_s5 = inlined_call_operand.hbm [shape: bf16[32,256], index: 5, kind: output, shape index: {}]  }
   0x1   :  { %1547 = sst [smem:[#allocation18_spill]] %s1529_s1 }
   0x2   :  { %10 = vsyncpa [#allocation3], 0 }
   0x3   :  { %12 = vsyncpa [#allocation3 + $0x1], 0 }
   0x4   :  { %13 = vsyncpa [#allocation6], 0 }
   0x5   :  { %15 = vsyncpa [#allocation6 + $0x1], 0 }
   0x6   :  { %16 = vsyncpa [#allocation9], 0 }
   0x7   :  { %17 = vsyncpa [#allocation4], 0 }
   0x8   :  { %19 = vsyncpa [#allocation4 + $0x1], 0  ;;  %s1240_s18 = smov 0   ;;  %s1242_s19 = smov 0  }
   0x9   :  { %s1244_s20 = smov 0   ;;  %s1246_s21 = smov 0  }
   0xa LB: > { %1548 = sst [smem:[#allocation15_spill]] %s1195_s20  ;;  %s1261_s22 = sadd.s32 1, %s1199_s21   ;;  %s1199_s21 = sphi %s1246_s21, %s1570_s21   ;;  %s1195_s20 = sphi %s1244_s20, %s1575_s20   ;;  %s1191_s19 = sphi %s1242_s19, %s1574_s19   ;;  %s1187_s18 = sphi %s1240_s18, %s1573_s18  }
   0xb   : > { %1549 = sst [smem:[#allocation16_spill]] %s1261_s22  ;;  %s32_s23 = sadd.s32 1, %s1195_s20 }
   0xc   : > { %s29_s24 = ssub.s32 %s1199_s21, %s1261_s22  ;;  %p1534_p0 = scmp.ne.s32.totalorder %s1195_s20, %s1191_s19 }
   0xd   : > { %p30_p1 = scmp.eq.s32.totalorder %s29_s24, 0  ;;  %p40_p2 = scmp.eq.s32.totalorder %s1199_s21, 0 }
   0xe   : > { %p958_p5 = scmp.lt.s32.totalorder %s1199_s21, 2  ;;  %s205_s26 = sand.u32 1, %s1195_s20  }
   0xf   : > { %s1270_s25 = scalar_select %p30_p1, %s1195_s20, %s32_s23  }
  0x10   : > { %p41_p3 = por %p40_p2, %p1534_p0  ;;  %s1280_s27 = sshll.u32 %s205_s26, 3 }
  0x11   : > { %1550 = sst [smem:[#allocation17_spill]] %s1270_s25  ;;  %s1283_s28 = sshll.u32 %s1199_s21, 7 }
  0x12   : > { %p1285_p6 = pnand %p958_p5, %p41_p3  ;;  %s226_s30 = sand.u32 1, %s1199_s21  }
  0x13   : > { %s1552_s1 = sld [smem:[#allocation18_spill]]  ;;  %s230_s9 = scalar_lea.vmem [#allocation5], %s1280_s27 }
  0x14   : > { %s237_s10 = sshll.u32 %s230_s9, 4  ;;  %s1299_s11 = scalar_lea.sflag [#allocation6], %s226_s30  ;;  %s1297_s10 = int_to_ptr.vmem [resolvable:$true] %s237_s10 }
  0x15   : > { %p1305_p8 = pneg %p1285_p6 }
  0x19   : > { %s1294_s8 = scalar_lea.hbm %s1552_s1, %s1283_s28  ;;  %s1022_s16 = scalar_lea.hbm %s1552_s1, 256 }
  0x1a   : > { %s1017_s12 = scalar_lea.hbm %s1294_s8, 128  ;;  %p1023_p11 = scmp.lt.s32.totalorder %s1294_s8, %s1552_s1 }
  0x1b   : > { %p1018_p7 = scmp.ne.s32.totalorder %s1294_s8, %s1017_s12  ;;  %p1024_p12 = scmp.lt.s32.totalorder %s1022_s16, %s1017_s12 }
  0x1d   : > { %p1020_p9 = pnand %p1305_p8, %p1018_p7  ;;  %p1025_p13 = por %p1024_p12, %p1023_p11 }
  0x1f   : > { %p1021_p10 = pneg %p1020_p9 }
  0x21   : > { %p1026_p1 = pnand %p1025_p13, %p1021_p10 }
  0x23   : > { %1029 = shalt.err (!%p1026_p1)
}
  0x24   : > { %s1030_s24 = scalar_lea.vmem %s1297_s10, 128  ;;  %s1201_s30 = smov [#allocation5]  }
  0x25   : > { %p1031_p2 = scmp.ne.s32.totalorder %s1297_s10, %s1030_s24  ;;  %s1035_s6 = sshll.u32 %s1201_s30, 4  ;;  %s1036_s6 = int_to_ptr.vmem [resolvable:$false] %s1035_s6 }
  0x26   : > { %s1037_s7 = scalar_lea.vmem %s1036_s6, 256  ;;  %p1038_p7 = scmp.lt.s32.totalorder %s1297_s10, %s1036_s6 }
  0x27   : > { %p1033_p3 = pnand %p1031_p2, %p1305_p8  ;;  %p1039_p9 = scmp.lt.s32.totalorder %s1037_s7, %s1030_s24 }
  0x29   : > { %p1034_p5 = pneg %p1033_p3  ;;  %p1040_p4 = por %p1039_p9, %p1038_p7 }
  0x2b   : > { %p1041_p0 = pnand %p1040_p4, %p1034_p5 }
  0x2d   : > { %1044 = shalt.err (!%p1041_p0)
}
  0x2e   : > { %s1535_s9 = smov 64   ;;  %s1537_s12 = smov 4  }
  0x2f   : > { %949 = dma.hbm_to_vmem [thread:$0]  (!%p1285_p6), %s1294_s8, 128, %s1297_s10, %s1299_s11, %s1535_s9, %s1535_s9, %s1537_s12  }
  0x30   : > { %s1332_s14 = sadd.s32 4294967295, %s1199_s21   ;;  %s820_s15 = sadd.s32 4294967294, %s1199_s21  }
  0x31   : > { %p45_p0 = scmp.ne.s32.totalorder %s1191_s19, %s1187_s18  ;;  %p1541_p4 = scmp.eq.s32.totalorder %s1332_s14, 0 }
  0x32   : > { %p163_p10 = scmp.eq.s32.totalorder %s1332_s14, 1  ;;  %p169_p11 = scmp.eq.s32.totalorder %s820_s15, 1 }
  0x33   : > { %p1341_p12 = por %p1541_p4, %p45_p0  ;;  %p821_p13 = scmp.ge.s32.totalorder %s1199_s21, 1 }
  0x34   : > { %p1555_p1 = scmp.ne.s32.totalorder %s1195_s20, %s1191_s19  ;;  %p1353_p3 = por %p169_p11, %p45_p0 }
  0x35   : > { %s1554_s16 = scalar_select %p1341_p12, 1, 0 }
  0x36   : > { %p1349_p2 = por %p163_p10, %p1555_p1  ;;  %p176_p5 = scmp.lt.s32.totalorder %s1199_s21, 3 }
  0x37   : > { %s1557_s10 = scalar_select %p1353_p3, 1, 0 }
  0x38   : > { %s1556_s8 = scalar_select %p1349_p2, 1, 0 }
  0x39   : > { %p1358_p7 = pnand %p821_p13, %p176_p5  ;;  %s1204_s23 = smov [#allocation8]  }
  0x3a   : > { %s188_s24 = sshll.u32 %s1204_s23, 4  ;;  %s1370_s7 = scalar_lea.hbm %s1528_s0, %s1283_s28  ;;  %s1362_s24 = int_to_ptr.vmem [resolvable:$true] %s188_s24 }
  0x3b   : > { %s1558_s17 = scalar_select %p1358_p7, 1, 0 }
  0x3c   : > { %p939_p9 = pneg %p1358_p7  ;;  %s209_s15 = scalar_lea.vmem [#allocation2], %s1280_s27 }
  0x3d   : > { %s216_s9 = sshll.u32 %s209_s15, 4  ;;  %s206_s23 = scalar_lea.sflag [#allocation3], %s205_s26  ;;  %s1379_s9 = int_to_ptr.vmem [resolvable:$true] %s216_s9 }
  0x3e   : > { %p1375_p0 = pnand %p939_p9, %p1541_p4  ;;  %s1045_s1 = scalar_lea.hbm %s1370_s7, 128 }
  0x3f   : > { %p1046_p10 = scmp.ne.s32.totalorder %s1370_s7, %s1045_s1  ;;  %s1050_s25 = scalar_lea.hbm %s1528_s0, 256 }
  0x40   : > { %s1559_s12 = scalar_select %p1375_p0, 1, 0 }
  0x41   : > { %p1048_p11 = pnand %p1046_p10, %p1305_p8  ;;  %p1051_p1 = scmp.lt.s32.totalorder %s1370_s7, %s1528_s0 }
  0x42   : > { %p1052_p5 = scmp.lt.s32.totalorder %s1050_s25, %s1045_s1 }
  0x43   : > { %p1049_p13 = pneg %p1048_p11 }
  0x44   : > { %p1053_p9 = por %p1052_p5, %p1051_p1 }
  0x46   : > { %p1054_p4 = pnand %p1053_p9, %p1049_p13 }
  0x48   : > { %1057 = shalt.err (!%p1054_p4)
}
  0x49   : > { %s1058_s26 = scalar_lea.vmem %s1379_s9, 128  ;;  %s1205_s20 = smov [#allocation2]  }
  0x4a   : > { %p1059_p3 = scmp.ne.s32.totalorder %s1379_s9, %s1058_s26  ;;  %s1063_s30 = sshll.u32 %s1205_s20, 4  ;;  %s1064_s30 = int_to_ptr.vmem [resolvable:$false] %s1063_s30 }
  0x4b   : > { %s1065_s6 = scalar_lea.vmem %s1064_s30, 256  ;;  %p1066_p2 = scmp.lt.s32.totalorder %s1379_s9, %s1064_s30 }
  0x4c   : > { %p1061_p10 = pnand %p1059_p3, %p1305_p8  ;;  %p1067_p12 = scmp.lt.s32.totalorder %s1065_s6, %s1058_s26 }
  0x4e   : > { %p1062_p11 = pneg %p1061_p10  ;;  %p1068_p7 = por %p1067_p12, %p1066_p2 }
  0x50   : > { %p1069_p0 = pnand %p1068_p7, %p1062_p11 }
  0x52   : > { %1072 = shalt.err (!%p1069_p0)
}
  0x53   : > { %s1560_s1 = smov 4   ;;  %s1561_s22 = smov 64  }
  0x54   : > { %946 = dma.hbm_to_vmem [thread:$0]  (!%p1285_p6), %s1370_s7, 128, %s1379_s9, %s206_s23, %s1561_s22, %s1561_s22, %s1560_s1  }
  0x55   : > { %s1410_s15 = scalar_lea.hbm %s1530_s2, %s1283_s28  ;;  %p1562_p4 = scmp.ne.s32.totalorder %s1559_s12, 0 }
  0x56   : > { %s1084_s26 = scalar_lea.vmem %s1362_s24, 2048  ;;  %p1092_p0 = scmp.lt.s32.totalorder %s1362_s24, %s1362_s24 }
  0x57   : > { %p1075_p12 = pneg %p1562_p4  ;;  %p1085_p2 = scmp.ne.s32.totalorder %s1362_s24, %s1084_s26 }
  0x58   : > { %p1093_p13 = scmp.lt.s32.totalorder %s1084_s26, %s1084_s26 }
  0x59   : > { %p1087_p3 = pnand %p1085_p2, %p1075_p12 }
  0x5a   : > { %p1094_p1 = por %p1093_p13, %p1092_p0 }
  0x5b   : > { %p1088_p7 = pneg %p1087_p3 }
  0x5d   : > { %p1095_p5 = pnand %p1094_p1, %p1088_p7 }
  0x5f   : > { %1098 = shalt.err (!%p1095_p5)
}
  0x60   : > { %942 = dma.hbm_to_vmem [thread:$0]  (!%p1562_p4), %s1531_s3, 2048, %s1362_s24, [#allocation9], %s1561_s22, %s1561_s22, %s1560_s1  }
  0x61   : > { %s251_s7 = scalar_lea.vmem [#allocation7], %s1280_s27  ;;  %s1099_s30 = scalar_lea.hbm %s1410_s15, 128 }
  0x62   : > { %s258_s23 = sshll.u32 %s251_s7, 4  ;;  %p1100_p9 = scmp.ne.s32.totalorder %s1410_s15, %s1099_s30  ;;  %s259_s23 = int_to_ptr.vmem [resolvable:$true] %s258_s23 }
  0x63   : > { %s1104_s20 = scalar_lea.hbm %s1530_s2, 256  ;;  %p1105_p12 = scmp.lt.s32.totalorder %s1410_s15, %s1530_s2 }
  0x64   : > { %p1102_p10 = pnand %p1100_p9, %p1305_p8  ;;  %p1106_p2 = scmp.lt.s32.totalorder %s1104_s20, %s1099_s30 }
  0x66   : > { %p1103_p11 = pneg %p1102_p10  ;;  %p1107_p3 = por %p1106_p2, %p1105_p12 }
  0x68   : > { %p1108_p7 = pnand %p1107_p3, %p1103_p11 }
  0x6a   : > { %1111 = shalt.err (!%p1108_p7)
}
  0x6b   : > { %s1112_s27 = scalar_lea.vmem %s259_s23, 128  ;;  %s1206_s24 = smov [#allocation7]  }
  0x6c   : > { %p1113_p4 = scmp.ne.s32.totalorder %s259_s23, %s1112_s27  ;;  %s1117_s28 = sshll.u32 %s1206_s24, 4  ;;  %s1118_s28 = int_to_ptr.vmem [resolvable:$false] %s1117_s28 }
  0x6d   : > { %s1119_s9 = scalar_lea.vmem %s1118_s28, 256  ;;  %p1120_p1 = scmp.lt.s32.totalorder %s259_s23, %s1118_s28 }
  0x6e   : > { %p1115_p0 = pnand %p1113_p4, %p1305_p8  ;;  %p1121_p5 = scmp.lt.s32.totalorder %s1119_s9, %s1112_s27 }
  0x70   : > { %p1116_p13 = pneg %p1115_p0  ;;  %p1122_p9 = por %p1121_p5, %p1120_p1 }
  0x72   : > { %p1123_p10 = pnand %p1122_p9, %p1116_p13 }
  0x74   : > { %1126 = shalt.err (!%p1123_p10)
}
  0x75   : > { %952 = dma.hbm_to_vmem [thread:$0]  (!%p1285_p6), %s1410_s15, 128, %s259_s23, %s1299_s11, %s1561_s22, %s1561_s22, %s1560_s1  }
  0x76   : > { %p1563_p8 = scmp.ne.s32.totalorder %s1558_s17, 0 }
  0x77   : > { %s1451_s13 = sand.u32 (!%p1563_p8), 1, %s1191_s19   ;;  %p1564_p11 = scmp.ne.s32.totalorder (!%p1563_p8), %s1554_s16, 0 }
  0x78   : > { %270 = sbr.rel (%p1563_p8) target bundleno = 484 (0x1e4), region = 40  ;;  %s1454_s7 = sshll.u32 (!%p1563_p8), %s1451_s13, 3 }
  0x79   : > { %s273_s30 = scalar_lea.sflag (!%p1563_p8), [#allocation3], %s1451_s13  ;;  %s276_s29 = scalar_lea.vmem (!%p1563_p8), [#allocation2], %s1454_s7 }
  0x7d   : > { %1170 = dma.done.wait (%p1564_p11), %s273_s30, 128  }
  0x7e   : > { %1172 = vsyncadd (%p1564_p11), %s273_s30, 4294967168  ;;  %s281_s11 = sand.u32 1, %s1332_s14   ;;  %s285_s1 = scalar_lea.vmem [#allocation5], %s1454_s7 }
  0x7f   : > { %s282_s17 = scalar_lea.sflag [#allocation6], %s281_s11 }
  0x80   : > { %1174 = dma.done.wait (%p1564_p11), %s282_s17, 256  }
  0x81   : > { %1176 = vsyncadd (%p1564_p11), %s282_s17, 4294967040  ;;  %s294_s22 = scalar_lea.vmem [#allocation7], %s1454_s7  ;;  %p1565_p6 = scmp.eq.s32.totalorder %s1332_s14, 0 }
  0x83   : > { %1178 = dma.done.wait (%p1565_p6), [#allocation9], 2048   ;;  %p1566_p12 = pmov %p1565_p6 }
  0x84   : > { %v998_v0 = vld [vmem:[#allocation8 + $0x78] sm:$0xff]   ;;  %v1000_v2 = vld [vmem:[#allocation8 + $0x70] sm:$0xff]   ;;  %v1002_v4 = vld [vmem:[#allocation8 + $0x68] sm:$0xff]   ;;  %v376_v19 = vlaneseq  ;;  %s838_s23 = sshll.u32 %s1451_s13, 4  ;;  %s872_s20 = sshll.u32 %s1332_s14, 8 }
  0x85   : > { %1180 = vsyncadd (%p1566_p12), [#allocation9], 4294965248  ;;  %v999_v1 = vld [vmem:[#allocation8 + $0x38] sm:$0xff]   ;;  %873 = vmatprep.subr.bf16.mxu0 %v998_v0  ;;  %891 = vmatprep.subr.bf16.mxu1 %v998_v0  ;;  %v1001_v3 = vld [vmem:[#allocation8 + $0x30] sm:$0xff]   ;;  %s334_s12 = scalar_lea.vmem [#allocation10], %s838_s23  ;;  %s1483_s27 = scalar_lea.hbm %s1533_s5, %s872_s20 }
  0x86   : > { %874 = vmatpush3.bf16.xpose.msra.mxu0 %v999_v1  ;;  %892 = vmatpush3.bf16.xpose.msra.mxu1 %v999_v1  ;;  %v1003_v5 = vld [vmem:[#allocation8 + $0x28] sm:$0xff]   ;;  %v1004_v6 = vld [vmem:[#allocation8 + $0x60] sm:$0xff]   ;;  %v1014_v7 = vld [vmem:[%s276_s29] sm:$0xff]   ;;  %v377_v20 = vshrl.u32 %v376_v19, 7  ;;  %s694_s6 = sshll.u32 %s334_s12, 4  ;;  %s680_s24 = scalar_lea.sflag [#allocation4], %s1451_s13  ;;  %s1485_s6 = int_to_ptr.vmem [resolvable:$true] %s694_s6 }
  0x87   : > { %875 = vmatprep.subr.bf16.mxu0 %v1000_v2  ;;  %893 = vmatprep.subr.bf16.mxu1 %v1000_v2  ;;  %v1015_v8 = vld [vmem:[%s285_s1] sm:$0xff]   ;;  %v1006_v10 = vld [vmem:[#allocation8 + $0x58] sm:$0xff]   ;;  %v1008_v12 = vld [vmem:[#allocation8 + $0x50] sm:$0xff]   ;;  %s1127_s28 = scalar_lea.vmem %s1485_s6, 256  ;;  %p1567_p3 = scmp.ne.s32.totalorder %s1556_s8, 0 }
  0x88   : > { %889 = vmatprep.mubr.bf16.mxu0 %v1014_v7  ;;  %907 = vmatprep.mubr.bf16.mxu1 %v1015_v8  ;;  %v1005_v9 = vld [vmem:[#allocation8 + $0x20] sm:$0xff]   ;;  %v1007_v11 = vld [vmem:[#allocation8 + $0x18] sm:$0xff]   ;;  %v1009_v13 = vld [vmem:[#allocation8 + $0x10] sm:$0xff]   ;;  %v378_v23 = vsub.s32 0, %v377_v20  ;;  %v382_v24 = vsub.s32 1, %v377_v20  ;;  %p1128_p2 = scmp.ne.s32.totalorder %s1485_s6, %s1127_s28  ;;  %s1207_s14 = smov [#allocation10]  }
  0x89   : > { %v1010_v14 = vld [vmem:[#allocation8 + $0x48] sm:$0xff]   ;;  %v1012_v16 = vld [vmem:[#allocation8 + $0x40] sm:$0xff]   ;;  %v1016_v18 = vld [vmem:[%s294_s22] sm:$0xff]   ;;  %s1131_s9 = sshll.u32 %s1207_s14, 4  ;;  %s1132_s9 = int_to_ptr.vmem [resolvable:$false] %s1131_s9 }
  0x8a   : > { %v1011_v15 = vld [vmem:[#allocation8 + $0x8] sm:$0xff]   ;;  %v1013_v17 = vld [vmem:[#allocation8] sm:$0xff]   ;;  %v372_v25 = vld [vmem:[%s1532_s4] sm:$0x3]  ;;  %p1129_p7 = pnand %p1128_p2, %p1567_p3  ;;  %s1133_s7 = scalar_lea.vmem %s1132_s9, 512 }
  0x8b   : > { %v379_v28 = vrot.slane %v372_v25, %v378_v23  ;;  %v383_v29 = vrot.slane %v372_v25, %v382_v24  ;;  %p1134_p0 = scmp.lt.s32.totalorder %s1485_s6, %s1132_s9  ;;  %p1135_p13 = scmp.lt.s32.totalorder %s1133_s7, %s1127_s28 }
  0x8c   : > { %p1130_p4 = pneg %p1129_p7 }
  0x8d   : > { %p1136_p1 = por %p1135_p13, %p1134_p0 }
  0x8e   : > { %876 = vmatpush3.bf16.xpose.msra.mxu0 %v1001_v3  ;;  %894 = vmatpush3.bf16.xpose.msra.mxu1 %v1001_v3 }
  0x8f   : > { %877 = vmatprep.subr.bf16.mxu0 %v1002_v4  ;;  %895 = vmatprep.subr.bf16.mxu1 %v1002_v4  ;;  %p1137_p5 = pnand %p1136_p1, %p1130_p4 }
  0x96   : > { %878 = vmatpush3.bf16.xpose.msra.mxu0 %v1003_v5  ;;  %896 = vmatpush3.bf16.xpose.msra.mxu1 %v1003_v5 }
  0x97   : > { %879 = vmatprep.subr.bf16.mxu0 %v1004_v6  ;;  %897 = vmatprep.subr.bf16.mxu1 %v1004_v6 }
  0x9e   : > { %880 = vmatpush3.bf16.xpose.msra.mxu0 %v1005_v9  ;;  %898 = vmatpush3.bf16.xpose.msra.mxu1 %v1005_v9 }
  0x9f   : > { %881 = vmatprep.subr.bf16.mxu0 %v1006_v10  ;;  %899 = vmatprep.subr.bf16.mxu1 %v1006_v10 }
  0xa6   : > { %882 = vmatpush3.bf16.xpose.msra.mxu0 %v1007_v11  ;;  %900 = vmatpush3.bf16.xpose.msra.mxu1 %v1007_v11 }
  0xa7   : > { %883 = vmatprep.subr.bf16.mxu0 %v1008_v12  ;;  %901 = vmatprep.subr.bf16.mxu1 %v1008_v12 }
  0xae   : > { %884 = vmatpush3.bf16.xpose.msra.mxu0 %v1009_v13  ;;  %902 = vmatpush3.bf16.xpose.msra.mxu1 %v1009_v13 }
  0xaf   : > { %885 = vmatprep.subr.bf16.mxu0 %v1010_v14  ;;  %903 = vmatprep.subr.bf16.mxu1 %v1010_v14 }
  0xb6   : > { %886 = vmatpush3.bf16.xpose.msra.mxu0 %v1011_v15  ;;  %904 = vmatpush3.bf16.xpose.msra.mxu1 %v1011_v15 }
  0xb7   : > { %887 = vmatprep.subr.bf16.mxu0 %v1012_v16  ;;  %905 = vmatprep.subr.bf16.mxu1 %v1012_v16 }
  0xbe   : > { %888 = vmatpush3.bf16.xpose.msra.mxu0 %v1013_v17  ;;  %906 = vmatpush3.bf16.xpose.msra.mxu1 %v1013_v17 }
  0xbf   : > { %909 = vmatprep.subr.bf16.mxu0 %v998_v0 }
  0xc5   : > { %890 = vmatmul.mubr.bf16.vlgmr.msra.gmra.mxu0 %v1014_v7  ;;  %908 = vmatmul.mubr.bf16.vlgmr.msra.gmra.mxu1 %v1015_v8 }
  0xc6   : > { %910 = vmatpush3.bf16.xpose.msra.mxu0 %v999_v1  ;;  %925 = vmatprep.mubr.bf16.mxu0 %v1016_v18 }
  0xc7   : > { %911 = vmatprep.subr.bf16.mxu0 %v1000_v2 }
  0xce   : > { %912 = vmatpush3.bf16.xpose.msra.mxu0 %v1001_v3 }
  0xcf   : > { %913 = vmatprep.subr.bf16.mxu0 %v1002_v4 }
  0xd6   : > { %914 = vmatpush3.bf16.xpose.msra.mxu0 %v1003_v5 }
  0xd7   : > { %915 = vmatprep.subr.bf16.mxu0 %v1004_v6 }
  0xde   : > { %916 = vmatpush3.bf16.xpose.msra.mxu0 %v1005_v9 }
  0xdf   : > { %917 = vmatprep.subr.bf16.mxu0 %v1006_v10 }
  0xe6   : > { %918 = vmatpush3.bf16.xpose.msra.mxu0 %v1007_v11 }
  0xe7   : > { %919 = vmatprep.subr.bf16.mxu0 %v1008_v12 }
  0xee   : > { %920 = vmatpush3.bf16.xpose.msra.mxu0 %v1009_v13 }
  0xef   : > { %921 = vmatprep.subr.bf16.mxu0 %v1010_v14 }
  0xf6   : > { %922 = vmatpush3.bf16.xpose.msra.mxu0 %v1011_v15 }
  0xf7   : > { %923 = vmatprep.subr.bf16.mxu0 %v1012_v16 }
  0xfe   : > { %924 = vmatpush3.bf16.xpose.msra.mxu0 %v1013_v17 }
 0x105   : > { %926 = vmatmul.mubr.bf16.vlgmr.msra.gmra.mxu0 %v1016_v18 }
 0x185   : > { %v522_v21 = vpop.f32.mrf.mxu0  ;;  %v581_v22 = vpop.f32.mrf.mxu1 }
 0x186   : > { %v523_v32 = vadd.f32 %v522_v21, %v379_v28  ;;  %v582_v33 = vadd.f32 %v581_v22, %v379_v28 }
 0x187   : > { %v524_v26 = vpop.f32.mrf.mxu0  ;;  %v583_v27 = vpop.f32.mrf.mxu1 }
 0x188   : > { %v525_v34 = vadd.f32 %v524_v26, %v383_v29  ;;  %v584_v35 = vadd.f32 %v583_v27, %v383_v29  ;;  %v531_v38 = vmul.f32 0.2, %v523_v32  ;;  %v590_v39 = vmul.f32 0.2, %v582_v33 }
 0x189   : > { %v526_v30 = vpop.f32.mrf.mxu0  ;;  %v585_v31 = vpop.f32.mrf.mxu1 }
 0x18a   : > { %v532_v40 = vmul.f32 0.2, %v525_v34  ;;  %v591_v41 = vmul.f32 0.2, %v584_v35  ;;  %v527_v42 = vadd.f32 %v526_v30, %v379_v28  ;;  %v586_v43 = vadd.f32 %v585_v31, %v379_v28 }
 0x18b   : > { %v528_v36 = vpop.f32.mrf.mxu0  ;;  %v587_v37 = vpop.f32.mrf.mxu1  ;;  %v535_v47 = vmax.f32 %v523_v32, %v531_v38  ;;  %v594_v48 = vmax.f32 %v582_v33, %v590_v39 }
 0x18c   : > { %v529_v44 = vadd.f32 %v528_v36, %v383_v29  ;;  %v588_v45 = vadd.f32 %v587_v37, %v383_v29  ;;  %v536_v49 = vmax.f32 %v525_v34, %v532_v40  ;;  %v595_v51 = vmax.f32 %v584_v35, %v591_v41 }
 0x18d   : > { %v533_v52 = vmul.f32 0.2, %v527_v42  ;;  %v592_v53 = vmul.f32 0.2, %v586_v43  ;;  %v598_v60 = vadd.f32 %v594_v48, %v535_v47 }
 0x18e   : > { %v534_v54 = vmul.f32 0.2, %v529_v44  ;;  %v593_v56 = vmul.f32 0.2, %v588_v45  ;;  %v599_v0 = vadd.f32 %v595_v51, %v536_v49 }
 0x18f   : > { %v537_v1 = vmax.f32 %v527_v42, %v533_v52  ;;  %v596_v2 = vmax.f32 %v586_v43, %v592_v53 }
 0x190   : > { %v538_v3 = vmax.f32 %v529_v44, %v534_v54  ;;  %v597_v5 = vmax.f32 %v588_v45, %v593_v56 }
 0x191   : > { %v600_v13 = vadd.f32 %v596_v2, %v537_v1 }
 0x192   : > { %v601_v14 = vadd.f32 %v597_v5, %v538_v3 }
 0x1c5   : > { %v644_v46 = vpop.f32.mrf.mxu0 }
 0x1c6   : > { %v645_v50 = vadd.f32 %v644_v46, %v379_v28 }
 0x1c7   : > { %v646_v55 = vpop.f32.mrf.mxu0 }
 0x1c8   : > { %v653_v57 = vmul.f32 0.2, %v645_v50  ;;  %v647_v58 = vadd.f32 %v646_v55, %v383_v29 }
 0x1c9   : > { %v648_v59 = vpop.f32.mrf.mxu0 }
 0x1ca   : > { %v657_v61 = vmax.f32 %v645_v50, %v653_v57  ;;  %v654_v62 = vmul.f32 0.2, %v647_v58  ;;  %v649_v63 = vadd.f32 %v648_v59, %v379_v28 }
 0x1cb   : > { %v650_v4 = vpop.f32.mrf.mxu0 }
 0x1cc   : > { %v658_v6 = vmax.f32 %v647_v58, %v654_v62  ;;  %v655_v7 = vmul.f32 0.2, %v649_v63  ;;  %v651_v8 = vadd.f32 %v650_v4, %v383_v29  ;;  %v661_v9 = vsub.f32 %v598_v60, %v657_v61 }
 0x1ce   : > { %v662_v10 = vsub.f32 %v599_v0, %v658_v6  ;;  %v659_v11 = vmax.f32 %v649_v63, %v655_v7  ;;  %v656_v12 = vmul.f32 0.2, %v651_v8 }
 0x1d0   : > { %v869_v15 = vpack.c.bf16 %v662_v10, %v661_v9  ;;  %v660_v16 = vmax.f32 %v651_v8, %v656_v12  ;;  %v663_v17 = vsub.f32 %v600_v13, %v659_v11 }
 0x1d2   : > { %677 = vst [vmem:[%s334_s12] sm:$0xff] %v869_v15  ;;  %v664_v18 = vsub.f32 %v601_v14, %v660_v16 }
 0x1d4   : > { %v870_v19 = vpack.c.bf16 %v664_v18, %v663_v17 }
 0x1d6   : > { %678 = vst [vmem:[%s334_s12 + $0x8] sm:$0xff] %v870_v19 }
 0x1d7   : > { %1140 = shalt.err (!%p1137_p5)
}
 0x1d8   : > { %s1141_s30 = scalar_lea.hbm %s1483_s27, 256  ;;  %s1145_s17 = scalar_lea.hbm %s1533_s5, 512 }
 0x1d9   : > { %p1142_p9 = scmp.ne.s32.totalorder %s1483_s27, %s1141_s30  ;;  %p1146_p11 = scmp.lt.s32.totalorder %s1483_s27, %s1533_s5 }
 0x1da   : > { %p1147_p6 = scmp.lt.s32.totalorder %s1145_s17, %s1141_s30 }
 0x1db   : > { %p1143_p10 = pnand %p1142_p9, %p1567_p3 }
 0x1dc   : > { %p1148_p12 = por %p1147_p6, %p1146_p11 }
 0x1dd   : > { %p1144_p8 = pneg %p1143_p10 }
 0x1df   : > { %p1149_p2 = pnand %p1148_p12, %p1144_p8 }
 0x1e1   : > { %1152 = shalt.err (!%p1149_p2)
}
 0x1e2   : > { %s1208_s16 = smov 128   ;;  %s1209_s15 = smov 8  }
 0x1e3   : > { %937 = dma.vmem_to_hbm [thread:$0]  (%p1567_p3), %s1485_s6, 256, %s1483_s27, %s680_s24, %s1208_s16, %s1208_s16, %s1209_s15  }
 0x1e4 PF: > { %s709_s23 = sand.u32 1, %s1187_s18   ;;  %p1568_p7 = scmp.ne.s32.totalorder %s1557_s10, 0 }
 0x1e5   : > { %p1569_p4 = scmp.ge.s32.totalorder %s1199_s21, 2  ;;  %s710_s12 = scalar_lea.sflag [#allocation4], %s709_s23 }
 0x1e7   : > { %p954_p0 = pnand %p1569_p4, %p1568_p7 }
 0x1e9   : > { %p955_p13 = pneg %p954_p0 }
 0x1eb   : > { %1182 = dma.done.wait (%p955_p13), %s710_s12, 256  }
 0x1ec   : > { %1184 = vsyncadd (%p955_p13), %s710_s12, 4294967040  ;;  %s1570_s21 = sld [smem:[#allocation16_spill]]  ;;  %s1573_s18 = smov %s1191_s19 }
 0x1ed   : > { %s1571_s20 = sld [smem:[#allocation15_spill]] }
 0x1ee   : > { %s1572_s25 = sld [smem:[#allocation17_spill]] }
 0x1f2   : > { %p22_p1 = scmp.ge.s32.totalorder %s1570_s21, 4  }
 0x1f3   : > { %s1574_s19 = smov %s1571_s20 }
 0x1f4   : > { %s1575_s20 = smov %s1572_s25  ;;  %24 = sbr.rel (!%p22_p1) target bundleno = 10 (0xa), region = 113 }
 0x1f9   :  { %715 = vsyncpa [#allocation3], 1 }
 0x1fa   :  { %717 = vsyncpa [#allocation3 + $0x1], 1 }
 0x1fb   :  { %718 = vsyncpa [#allocation6], 1 }
 0x1fc   :  { %720 = vsyncpa [#allocation6 + $0x1], 1 }
 0x1fd   :  { %721 = vsyncpa [#allocation9], 1 }
 0x1fe   :  { %722 = vsyncpa [#allocation4], 1 }
 0x1ff   :  { %724 = vsyncpa [#allocation4 + $0x1], 1 }

</bundles_post_ra>
